<compile_context>
chip_gen: v7x
topology: tpu7x:2x2x1
jax: 0.10.0
libtpu: 0.0.40
codegen_flags: <defaults>
</compile_context>

<pallas_src>
import functools
import inspect

import jax
import jax.numpy as jnp
from jax import lax
from jax.experimental import pallas as pl
from jax.experimental.pallas import tpu as pltpu


def _round_up(a, b):
    return ((a + b - 1) // b) * b


def _largest_dividing_tile(dim_pad, max_tile, quantum):
    """Largest multiple of `quantum` <= max_tile that divides dim_pad.

    `dim_pad` must itself be a multiple of `quantum`.
    """
    t = min(max_tile, dim_pad)
    t -= t % quantum
    while t > quantum and dim_pad % t:
        t -= quantum
    return max(t, quantum)


def _mix32(h):
    # murmur3-style 32-bit finalizer (good enough uniformity for dropout).
    h = h ^ (h >> 16)
    h = h * jnp.uint32(0x7FEB352D)
    h = h ^ (h >> 15)
    h = h * jnp.uint32(0x846CA68B)
    h = h ^ (h >> 16)
    return h


def dense_kernel(seed_ref, x_ref, w_ref, b_ref, o_ref, acc_ref,
                 *, p, training, use_relu):
    # NOTE: all grid queries live at the top level of the kernel body (never
    # inside a pl.when branch) so the interpret/CPU fallback can resolve them.
    i = pl.program_id(0)
    j = pl.program_id(1)
    k = pl.program_id(2)
    nk = pl.num_programs(2)

    @pl.when(k == 0)
    def _init():
        acc_ref[...] = jnp.zeros_like(acc_ref)

    # x tile: (tm, tk); w tile (PyTorch layout): (tn, tk).
    # Contract the last dims of both (A @ B^T) — the MXU-native
    # transposed-weight pattern (same contraction flash-attention uses for
    # q @ k.T), so no explicit vreg/XLU transpose is emitted.
    acc_ref[...] += lax.dot_general(
        x_ref[...], w_ref[...],
        dimension_numbers=(((1,), (1,)), ((), ())),
        preferred_element_type=jnp.float32)

    @pl.when(k == nk - 1)
    def _finalize():
        tm, tn = acc_ref.shape
        y = acc_ref[...] + b_ref[...]           # (1, tn) f32 broadcast

        if training and p > 0.0:
            if p >= 1.0:
                y = jnp.zeros_like(y)
            else:
                # Stateless dropout mask from global (row, col) indices so the
                # realized mask is independent of the tile decomposition.
                rows = lax.broadcasted_iota(jnp.int32, (tm, tn), 0) + i * tm
                cols = lax.broadcasted_iota(jnp.int32, (tm, tn), 1) + j * tn
                seed_u = seed_ref[0].astype(jnp.uint32)
                h = (rows.astype(jnp.uint32) * jnp.uint32(0x9E3779B1)
                     ^ cols.astype(jnp.uint32) * jnp.uint32(0x85EBCA77)
                     ^ seed_u * jnp.uint32(0xC2B2AE3D))
                h = _mix32(h)
                thr = jnp.uint32(int(p * (2 ** 32)))   # P(keep) = 1 - p
                keep = h >= thr
                y = jnp.where(keep, y * (1.0 / (1.0 - p)), jnp.zeros_like(y))

        if use_relu:
            y = jnp.maximum(y, 0.0)

        o_ref[...] = y.astype(o_ref.dtype)


def dense_forward(x, weight, bias, seed, *, dropout=0.1, training=True,
                  nonlinearity=None, tm=512, tn=512, tk=1024,
                  compute_dtype=jnp.bfloat16):
    """Pallas equivalent of Dense.forward.

    x:      (..., in_features)
    weight: (out_features, in_features)   -- PyTorch Linear convention
    bias:   (out_features,) or None
    """
    K = weight.shape[1]
    N = weight.shape[0]
    orig_lead = x.shape[:-1]
    out_dtype = x.dtype
    xm = x.reshape(-1, K)
    M = xm.shape[0]

    if bias is None:
        bias = jnp.zeros((N,), dtype=jnp.float32)

    # ---- tile sizing --------------------------------------------------------
    # M: ragged handled by padding; small-M clamps to a multiple of 16 (bf16
    # sublane packing).  Large tm cuts weight re-streaming (w is re-read once
    # per M tile).
    if M >= tm:
        M_pad = _round_up(M, tm)
    else:
        tm = _round_up(max(M, 16), 16)
        M_pad = tm

    # N: lane-dense multiple of 128; prefer 256-wide tiles (v6e/v7x 2x256^2 MXU).
    N_pad = _round_up(N, 128)
    if N_pad % 256 == 0 and tn >= 256:
        tn = _largest_dividing_tile(N_pad, tn, 256)
    else:
        tn = _largest_dividing_tile(N_pad, tn, 128)

    # K: single full-extent block if it fits (no pad copy), else 256/128-aligned
    # K tiles with accumulation over the last grid axis.
    if K <= tk:
        tk = K
        K_pad = K
    else:
        K_pad = _round_up(K, 128)
        if K_pad % 256 == 0 and tk >= 256:
            tk = _largest_dividing_tile(K_pad, tk, 256)
        else:
            tk = _largest_dividing_tile(K_pad, tk, 128)

    # v7x has two TensorCores: make sure the parallel axes expose >= 2 blocks
    # when we can split N without going below 128 lanes.
    if (M_pad // tm) * (N_pad // tn) < 2 and tn >= 256:
        tn //= 2

    grid = (M_pad // tm, N_pad // tn, K_pad // tk)

    # ---- dtype + padding (pads only materialized when actually needed) -----
    xm = xm.astype(compute_dtype)
    w = weight.astype(compute_dtype)
    if (M_pad, K_pad) != (M, K):
        xm = jnp.pad(xm, ((0, M_pad - M), (0, K_pad - K)))
    if (N_pad, K_pad) != (N, K):
        w = jnp.pad(w, ((0, N_pad - N), (0, K_pad - K)))
    b2 = bias.astype(jnp.float32)
    if N_pad != N:
        b2 = jnp.pad(b2, (0, N_pad - N))
    b2 = b2.reshape(1, N_pad)

    seed_arr = jnp.array([seed], dtype=jnp.int32)

    use_relu = (nonlinearity == "ReLU")
    # TODO(synk): nonlinearities other than ReLU/None are not implemented.
    kernel = functools.partial(dense_kernel, p=float(dropout),
                               training=bool(training), use_relu=use_relu)

    call_kwargs = {}
    if (hasattr(pl, "CostEstimate")
            and "cost_estimate" in inspect.signature(pl.pallas_call).parameters):
        bytes_accessed = int(
            M_pad * K_pad * xm.dtype.itemsize                       # x read
            + (M_pad // tm) * N_pad * K_pad * w.dtype.itemsize      # w re-streams per M tile
            + M_pad * N_pad * jnp.dtype(out_dtype).itemsize)        # out write
        call_kwargs["cost_estimate"] = pl.CostEstimate(
            flops=2 * M_pad * N_pad * K_pad,
            transcendentals=0,
            bytes_accessed=bytes_accessed)

    out = pl.pallas_call(
        kernel,
        out_shape=jax.ShapeDtypeStruct((M_pad, N_pad), out_dtype),
        grid_spec=pltpu.PrefetchScalarGridSpec(
            num_scalar_prefetch=1,
            grid=grid,
            in_specs=[
                pl.BlockSpec((tm, tk), lambda i, j, k, s: (i, k)),  # x
                pl.BlockSpec((tn, tk), lambda i, j, k, s: (j, k)),  # w (N, K)
                pl.BlockSpec((1, tn), lambda i, j, k, s: (0, j)),   # bias (f32)
            ],
            out_specs=pl.BlockSpec((tm, tn), lambda i, j, k, s: (i, j)),
            scratch_shapes=[pltpu.VMEM((tm, tn), jnp.float32)],
        ),
        compiler_params=pltpu.CompilerParams(
            dimension_semantics=("parallel", "parallel", "arbitrary")),
        **call_kwargs,
    )(seed_arr, xm, w, b2)

    return out[:M, :N].reshape(*orig_lead, N)


if __name__ == "__main__":
    # Module config (matches Dense(in_features=32, out_features=64,
    #                              dropout=0.1, nonlinearity="ReLU"))
    in_features, out_features = 32, 64
    batch, seq = 2, 8
    dropout_p = 0.1

    key = jax.random.PRNGKey(0)
    kx, kw, kb = jax.random.split(key, 3)

    # Deterministic parameter init:
    #  - weight: xavier_normal_ (std = sqrt(2 / (fan_in + fan_out)))
    #  - bias:   PyTorch Linear default U(-1/sqrt(fan_in), 1/sqrt(fan_in))
    xavier_std = (2.0 / (in_features + out_features)) ** 0.5
    weight = xavier_std * jax.random.normal(kw, (out_features, in_features),
                                            dtype=jnp.float32)
    bound = 1.0 / (in_features ** 0.5)
    bias = jax.random.uniform(kb, (out_features,), dtype=jnp.float32,
                              minval=-bound, maxval=bound)

    x = jax.random.normal(kx, (batch, seq, in_features), dtype=jnp.float32)

    # Reference in the same precision the kernel uses: bf16 inputs, f32 accum.
    xb = x.astype(jnp.bfloat16)
    wb = weight.astype(jnp.bfloat16)
    ref = jnp.maximum(
        jnp.dot(xb, wb.T, preferred_element_type=jnp.float32) + bias, 0.0)

    # Eval mode (dropout = identity).
    y_eval = dense_forward(x, weight, bias, seed=0, dropout=dropout_p,
                           training=False, nonlinearity="ReLU")
    jax.block_until_ready(y_eval)
    assert y_eval.shape == (batch, seq, out_features)
    assert jnp.allclose(y_eval, ref, atol=1e-3, rtol=1e-3)

    # Train mode: exercises the in-kernel stateless hash dropout (deterministic
    # given the seed and tiling-invariant, but not bitwise-matched to torch RNG).
    y_train = dense_forward(x, weight, bias, seed=1234, dropout=dropout_p,
                            training=True, nonlinearity="ReLU")
    jax.block_until_ready(y_train)
    assert y_train.shape == (batch, seq, out_features)
    # Kept positions must equal ref / (1-p); dropped positions are exactly 0.
    kept = y_train != 0
    scaled = ref / (1.0 - dropout_p)
    assert jnp.allclose(jnp.where(kept, y_train, 0.0),
                        jnp.where(kept, scaled, 0.0), atol=1e-3, rtol=1e-3)

    print("KERNEL_OK")
</pallas_src>

<mosaic_0001>
module attributes {stable_mosaic.version = 11 : i64} {
  func.func @dense_kernel(%arg0: i32, %arg1: i32, %arg2: i32, %arg3: memref<1xi32, #tpu.memory_space<smem>>, %arg4: memref<16x32xbf16, #tpu.memory_space<vmem>>, %arg5: memref<128x32xbf16, #tpu.memory_space<vmem>>, %arg6: memref<1x128xf32, #tpu.memory_space<vmem>>, %arg7: memref<16x128xf32, #tpu.memory_space<vmem>>, %arg8: memref<16x128xf32, #tpu.memory_space<vmem>>) attributes {dimension_semantics = [#tpu.dimension_semantics<parallel>, #tpu.dimension_semantics<parallel>, #tpu.dimension_semantics<arbitrary>], iteration_bounds = array<i64: 1, 1, 1>, scalar_prefetch = 1 : i64, scratch_operands = 1 : i64, tpu.core_type = #tpu.core_type<tc>, window_params = [{transform_indices = @transform_0, window_bounds = array<i64: 16, 32>}, {transform_indices = @transform_1, window_bounds = array<i64: 128, 32>}, {transform_indices = @transform_2, window_bounds = array<i64: 1, 128>}, {transform_indices = @transform_3, window_bounds = array<i64: 16, 128>}]} {
    %c0_i32 = arith.constant 0 : i32
    %0 = arith.cmpi eq, %arg2, %c0_i32 : i32
    %1 = arith.extui %0 : i1 to i32
    %c0_i32_0 = arith.constant 0 : i32
    %2 = arith.cmpi ne, %1, %c0_i32_0 : i32
    scf.if %2 {
      %cst_10 = arith.constant 0.000000e+00 : f32
      %12 = vector.broadcast %cst_10 : f32 to vector<16x128xf32>
      %c0_11 = arith.constant 0 : index
      %c0_12 = arith.constant 0 : index
      %13 = vector.load %arg8[%c0_11, %c0_12] : memref<16x128xf32, #tpu.memory_space<vmem>>, vector<16x128xf32>
      tpu.vector_store %arg8[%c0_11, %c0_12], %12 {strides = array<i32>} : memref<16x128xf32, #tpu.memory_space<vmem>>, vector<16x128xf32>,
    } else {
    }
    %c0 = arith.constant 0 : index
    %c0_1 = arith.constant 0 : index
    %3 = vector.load %arg8[%c0, %c0_1] : memref<16x128xf32, #tpu.memory_space<vmem>>, vector<16x128xf32>
    %c0_2 = arith.constant 0 : index
    %c0_3 = arith.constant 0 : index
    %4 = vector.load %arg4[%c0_2, %c0_3] : memref<16x32xbf16, #tpu.memory_space<vmem>>, vector<16x32xbf16>
    %c0_4 = arith.constant 0 : index
    %c0_5 = arith.constant 0 : index
    %5 = vector.load %arg5[%c0_4, %c0_5] : memref<128x32xbf16, #tpu.memory_space<vmem>>, vector<128x32xbf16>
    %cst = arith.constant dense<0.000000e+00> : vector<16x128xf32>
    %6 = tpu.matmul %4, %5, %cst {dimension_numbers = #tpu.dot_dimension_numbers<[1], [1], [0], [0], [0, 0, 1, 0], [], []>} : vector<16x32xbf16>, vector<128x32xbf16>, vector<16x128xf32> -> vector<16x128xf32>
    %7 = arith.addf %3, %6 : vector<16x128xf32>
    %c0_6 = arith.constant 0 : index
    %c0_7 = arith.constant 0 : index
    %8 = vector.load %arg8[%c0_6, %c0_7] : memref<16x128xf32, #tpu.memory_space<vmem>>, vector<16x128xf32>
    tpu.vector_store %arg8[%c0_6, %c0_7], %7 {strides = array<i32>} : memref<16x128xf32, #tpu.memory_space<vmem>>, vector<16x128xf32>,
    %c0_i32_8 = arith.constant 0 : i32
    %9 = arith.cmpi eq, %arg2, %c0_i32_8 : i32
    %10 = arith.extui %9 : i1 to i32
    %c0_i32_9 = arith.constant 0 : i32
    %11 = arith.cmpi ne, %10, %c0_i32_9 : i32
    scf.if %11 {
      %c0_10 = arith.constant 0 : index
      %c0_11 = arith.constant 0 : index
      %12 = vector.load %arg8[%c0_10, %c0_11] : memref<16x128xf32, #tpu.memory_space<vmem>>, vector<16x128xf32>
      %c0_12 = arith.constant 0 : index
      %c0_13 = arith.constant 0 : index
      %13 = vector.load %arg6[%c0_12, %c0_13] : memref<1x128xf32, #tpu.memory_space<vmem>>, vector<1x128xf32>
      %14 = vector.broadcast %13 : vector<1x128xf32> to vector<16x128xf32>
      %15 = arith.addf %12, %14 : vector<16x128xf32>
      %cst_14 = arith.constant 0.000000e+00 : f32
      %16 = vector.broadcast %cst_14 : f32 to vector<16x128xf32>
      %17 = arith.maximumf %15, %16 : vector<16x128xf32>
      %c0_15 = arith.constant 0 : index
      %c0_16 = arith.constant 0 : index
      %18 = vector.load %arg7[%c0_15, %c0_16] : memref<16x128xf32, #tpu.memory_space<vmem>>, vector<16x128xf32>
      tpu.vector_store %arg7[%c0_15, %c0_16], %17 {strides = array<i32>} : memref<16x128xf32, #tpu.memory_space<vmem>>, vector<16x128xf32>,
    } else {
    }
    return
  }
  func.func @transform_0(%arg0: i32, %arg1: i32, %arg2: i32, %arg3: memref<1xi32, #tpu.memory_space<smem>>) -> (i32, i32) {
    %c0_i32 = arith.constant 0 : i32
    return %arg0, %arg2 : i32, i32
  }
  func.func @transform_1(%arg0: i32, %arg1: i32, %arg2: i32, %arg3: memref<1xi32, #tpu.memory_space<smem>>) -> (i32, i32) {
    %c0_i32 = arith.constant 0 : i32
    return %arg1, %arg2 : i32, i32
  }
  func.func @transform_2(%arg0: i32, %arg1: i32, %arg2: i32, %arg3: memref<1xi32, #tpu.memory_space<smem>>) -> (i32, i32) {
    %c0_i32 = arith.constant 0 : i32
    %c0_i32_0 = arith.constant 0 : i32
    return %c0_i32, %arg1 : i32, i32
  }
  func.func @transform_3(%arg0: i32, %arg1: i32, %arg2: i32, %arg3: memref<1xi32, #tpu.memory_space<smem>>) -> (i32, i32) {
    %c0_i32 = arith.constant 0 : i32
    return %arg0, %arg1 : i32, i32
  }
}

</mosaic_0001>

<bundles_post_ra>
// kernel: tpu_custom_call.1
= control target key start
LH: loop header
LB: loop body
LE: loop exit
PB: predicated region body
PF: predicated region fallthrough
CT: control target
= control target key end

     0   :  { %v274_v1 = vmov 0.0   ;;  %vm89_vm0 = vcmask 261120   ;;  %vm275_vm1 = vmmov 0   ;;  %s355_s0 = inlined_call_operand.<no memory space> [shape: s32[1], index: 0, kind: input, shape index: {}]   ;;  %s356_s1 = inlined_call_operand.vmem [shape: bf16[16,32], index: 1, kind: input, shape index: {}]   ;;  %s357_s2 = inlined_call_operand.vmem [shape: bf16[128,32], index: 2, kind: input, shape index: {}]   ;;  %s358_s3 = inlined_call_operand.vmem [shape: f32[1,128], index: 3, kind: input, shape index: {}]   ;;  %s359_s4 = inlined_call_operand.hbm [shape: f32[16,128], index: 4, kind: output, shape index: {}]  }
   0x1   :  { %v241_v0 = vld [vmem:[%s357_s2] sm:$0xff]   ;;  %216 = vmatprep.subr.bf16.mxu0 %v274_v1  ;;  %v242_v3 = vld [vmem:[%s357_s2 + $0x8] sm:$0xff]   ;;  %232 = vmatprep.mubr.msk.bf16.mxu0 %vm275_vm1, %v274_v1 }
   0x2   :  { %v94_v2 = vsel %vm89_vm0, %v241_v0, 0  ;;  %v97_v4 = vsel %vm89_vm0, %v242_v3, 0 }
   0x3   :  { %217 = vmatpush3.bf16.xpose.msra.mxu0 %v94_v2 }
   0x4   :  { %218 = vmatprep.subr.bf16.mxu0 %v274_v1 }
   0x5   :  { %10 = vsyncpa [#allocation6], 0  ;;  %v243_v5 = vld [vmem:[%s357_s2 + $0x10] sm:$0xff]   ;;  %v244_v7 = vld [vmem:[%s357_s2 + $0x18] sm:$0xff]   ;;  %s276_s8 = smov [#allocation5]  }
   0x6   :  { %v100_v6 = vsel %vm89_vm0, %v243_v5, 0  ;;  %v103_v8 = vsel %vm89_vm0, %v244_v7, 0  ;;  %v245_v9 = vld [vmem:[%s357_s2 + $0x20] sm:$0xff]   ;;  %v246_v11 = vld [vmem:[%s357_s2 + $0x28] sm:$0xff]   ;;  %v247_v13 = vld [vmem:[%s357_s2 + $0x30] sm:$0xff]   ;;  %s185_s9 = sshll.u32 %s276_s8, 4  ;;  %s186_s9 = int_to_ptr.vmem [resolvable:$true] %s185_s9 }
   0x7   :  { %v106_v10 = vsel %vm89_vm0, %v245_v9, 0  ;;  %v109_v12 = vsel %vm89_vm0, %v246_v11, 0  ;;  %v112_v14 = vsel %vm89_vm0, %v247_v13, 0  ;;  %v248_v15 = vld [vmem:[%s357_s2 + $0x38] sm:$0xff]   ;;  %v249_v17 = vld [vmem:[%s356_s1] sm:$0xff]   ;;  %s250_s1 = scalar_lea.vmem %s186_s9, 256  ;;  %p255_p1 = scmp.lt.s32.totalorder %s186_s9, %s186_s9 }
   0x8   :  { %v115_v16 = vsel %vm89_vm0, %v248_v15, 0  ;;  %v206_v18 = vld [vmem:[%s358_s3] ss:$0 sm:$0xff]  ;;  %p251_p0 = scmp.ne.s32.totalorder %s186_s9, %s250_s1  ;;  %p256_p2 = scmp.lt.s32.totalorder %s250_s1, %s250_s1 }
   0xa   :  { %p257_p3 = por %p256_p2, %p255_p1 }
   0xb   :  { %219 = vmatpush3.bf16.xpose.msra.mxu0 %v97_v4 }
   0xc   :  { %220 = vmatprep.subr.bf16.mxu0 %v274_v1  ;;  %p258_p4 = pnand %p257_p3, %p251_p0 }
  0x13   :  { %221 = vmatpush3.bf16.xpose.msra.mxu0 %v100_v6 }
  0x14   :  { %222 = vmatprep.subr.bf16.mxu0 %v274_v1 }
  0x1b   :  { %223 = vmatpush3.bf16.xpose.msra.mxu0 %v103_v8 }
  0x1c   :  { %224 = vmatprep.subr.bf16.mxu0 %v274_v1 }
  0x23   :  { %225 = vmatpush3.bf16.xpose.msra.mxu0 %v106_v10 }
  0x24   :  { %226 = vmatprep.subr.bf16.mxu0 %v274_v1 }
  0x2b   :  { %227 = vmatpush3.bf16.xpose.msra.mxu0 %v109_v12 }
  0x2c   :  { %228 = vmatprep.subr.bf16.mxu0 %v274_v1 }
  0x33   :  { %229 = vmatpush3.bf16.xpose.msra.mxu0 %v112_v14 }
  0x34   :  { %230 = vmatprep.subr.bf16.mxu0 %v274_v1 }
  0x3b   :  { %231 = vmatpush3.bf16.xpose.msra.mxu0 %v115_v16 }
  0x42   :  { %233 = vmatmul.mubr.msk.bf16.vlgmr.msra.gmra.mrb[0].mxu0 %vm89_vm0, %v249_v17 }
 0x115   :  { %v151_v19 = vpop.f32.mrb[0].mxu0 }
 0x116   :  { %v174_v20 = vadd.f32 %v206_v18, %v151_v19  ;;  %v234_v21 = vpop.f32.mrb[1].mxu0 }
 0x117   :  { %v154_v22 = vpop.f32.mrb[2].mxu0 }
 0x118   :  { %v176_v23 = vmax.f32 %v174_v20, 0.0  ;;  %v175_v24 = vadd.f32 %v206_v18, %v154_v22  ;;  %v235_v25 = vpop.f32.mrb[3].mxu0 }
 0x11a   :  { %178 = vst [vmem:[#allocation5] sm:$0xff] %v176_v23  ;;  %v177_v26 = vmax.f32 %v175_v24, 0.0 }
 0x11c   :  { %179 = vst [vmem:[#allocation5 + $0x8] sm:$0xff] %v177_v26 }
 0x11d   :  { %261 = shalt.err (!%p258_p4)
}
 0x11e   :  { %s262_s10 = scalar_lea.hbm %s359_s4, 256 }
 0x11f   :  { %p263_p5 = scmp.ne.s32.totalorder %s359_s4, %s262_s10  ;;  %p266_p6 = scmp.lt.u32.totalorder %s262_s10, %s359_s4 }
 0x121   :  { %p268_p7 = pnand %p266_p6, %p263_p5 }
 0x123   :  { %271 = shalt.err (!%p268_p7)
}
 0x124   :  { %s277_s15 = smov 128   ;;  %s278_s16 = smov 8  }
 0x125   :  { %191 = dma.vmem_to_hbm [thread:$0]  %s186_s9, 256, %s359_s4, [#allocation6], %s277_s15, %s277_s15, %s278_s16  }
 0x126   :  { %272 = dma.done.wait [#allocation6], 256  }
 0x127   :  { %273 = vsyncadd [#allocation6], 4294967040 }
 0x128   :  { %195 = vsyncpa [#allocation6], 1 }

</bundles_post_ra>
